<compile_context>
chip_gen: v5e
topology: v5e:2x2
jax: 0.10.0
libtpu: 0.0.40
codegen_flags: <defaults>
</compile_context>

<pallas_src>
import jax
import jax.numpy as jnp
from jax.experimental import pallas as pl
from jax.experimental.pallas import tpu as pltpu


# ---------------------------------------------------------------------------
# Trace-time planning helpers (plain Python ints).
# ---------------------------------------------------------------------------

def _round_up(x, m):
    return ((x + m - 1) // m) * m


def _divisors(n):
    return [d for d in range(1, n + 1) if n % d == 0]


def _vmem_capacity_bytes():
    """Generation-aware VMEM capacity (64 MiB v7x, 128 MiB v5e/v6e)."""
    try:
        return int(pltpu.get_tpu_info().vmem_capacity_bytes)
    except Exception:
        return 64 << 20  # conservative default (v7x)


def _budgets():
    cap = _vmem_capacity_bytes()
    # 1 input + 1 output block, each double-buffered -> ~4 live block buffers.
    # ~8 MiB per buffer => >=16 MiB HBM traffic per grid step, so the ~0.35 us
    # fixed per-step overhead is <5% even at v7x's 3.2 TB/s HBM.
    target_block = min(8 << 20, cap // 8)
    return cap, target_block


def _vmem_limit(cap, live_bytes):
    needed = live_bytes + (4 << 20)  # headroom for Mosaic internal scratch
    return int(min(max(needed, 32 << 20), cap - (2 << 20)))


# ---------------------------------------------------------------------------
# Path 1: small / non-aligned H*W  —  in-kernel (g, C/g) swap over a full-g
# block.  Dense (channels, HW) trailing layout; contiguous multi-100-KiB DMAs.
# ---------------------------------------------------------------------------

def _shuffle_small_hw(x, g):
    N, C, H, W = x.shape
    cpg = C // g
    HW = H * W
    itemsize = jnp.dtype(x.dtype).itemsize
    cap, target_block = _budgets()

    sub = 8 * max(1, 4 // itemsize)      # sublane packing (8 f32 / 16 bf16)
    hw_pad = _round_up(HW, 128)          # lane padding of the trailing dim

    def block_bytes(n_tile, cpg_tile):
        in_b = n_tile * g * _round_up(cpg_tile, sub) * hw_pad * itemsize
        out_b = n_tile * cpg_tile * _round_up(g, sub) * hw_pad * itemsize
        return in_b, out_b

    # cpg tile: dense sublane multiples (or full cpg); largest under budget.
    legal = [d for d in _divisors(cpg) if d % sub == 0]
    if cpg not in legal:
        legal.append(cpg)
    legal.sort()
    cpg_tile = legal[0]                  # safety valve if nothing fits
    for d in legal:
        if max(block_bytes(1, d)) <= target_block:
            cpg_tile = d

    # Grow along N too, but keep >= 2 grid steps for megacore (v7x: 2 TCs).
    n_cap = (N // 2) if (cpg // cpg_tile == 1 and N >= 2) else N
    n_tile = 1
    for d in _divisors(N):
        if d <= max(1, n_cap) and max(block_bytes(d, cpg_tile)) <= target_block:
            n_tile = d

    in_b, out_b = block_bytes(n_tile, cpg_tile)

    x4 = x.reshape(N, g, cpg, HW)        # free reshape (metadata only)

    def kernel(x_ref, o_ref):
        # x_ref: (n_tile, g, cpg_tile, HW) ; o_ref: (n_tile, cpg_tile, g, HW)
        # Keep the strided (sublane-gather) access on the load side and the
        # stores dense: vst is the scarcer bundle slot.
        if cpg_tile <= max(256, g):
            for j in range(cpg_tile):
                o_ref[:, j, :, :] = x_ref[:, :, j, :]
        else:
            for i in range(g):
                o_ref[:, :, i, :] = x_ref[:, i, :, :]

    out4 = pl.pallas_call(
        kernel,
        out_shape=jax.ShapeDtypeStruct((N, cpg, g, HW), x.dtype),
        grid_spec=pltpu.PrefetchScalarGridSpec(
            num_scalar_prefetch=0,
            grid=(N // n_tile, cpg // cpg_tile),
            in_specs=[pl.BlockSpec((n_tile, g, cpg_tile, HW),
                                   lambda n, t: (n, 0, t, 0))],
            out_specs=pl.BlockSpec((n_tile, cpg_tile, g, HW),
                                   lambda n, t: (n, t, 0, 0)),
        ),
        compiler_params=pltpu.CompilerParams(
            dimension_semantics=("parallel", "parallel"),
            vmem_limit_bytes=_vmem_limit(cap, 2 * (in_b + out_b))),
        cost_estimate=pl.CostEstimate(
            flops=0, transcendentals=0,
            bytes_accessed=2 * N * C * HW * itemsize),
    )(x4)

    # (N, C/g, g, HW) -> (N, C, H, W) is a free reshape: c_out = j*g + i.
    return out4.reshape(N, C, H, W)


# ---------------------------------------------------------------------------
# Path 2: large, 128-aligned H*W  —  pure copy; the shuffle lives entirely in
# the BlockSpec index_maps (done for free by the pipeline DMAs).
# ---------------------------------------------------------------------------

def _shuffle_large_hw(x, g):
    N, C, H, W = x.shape
    cpg = C // g
    HW = H * W
    hw_o = HW // 128
    itemsize = jnp.dtype(x.dtype).itemsize
    cap, target_block = _budgets()

    lane_bytes = 128 * itemsize
    # Tile hw_o only if a single channel image alone exceeds the budget.
    hw_tile = hw_o
    if hw_o * lane_bytes > target_block:
        cands = [d for d in _divisors(hw_o) if d % 8 == 0] or [hw_o]
        hw_tile = cands[0]
        for d in cands:
            if d * lane_bytes <= target_block:
                hw_tile = d

    cpg_tile = 1
    for d in _divisors(cpg):
        if d * hw_tile * lane_bytes <= target_block:
            cpg_tile = d

    per_n = cpg_tile * hw_tile * lane_bytes
    steps_wo_n = g * (cpg // cpg_tile) * (hw_o // hw_tile)
    n_cap = N if steps_wo_n >= 2 else max(1, N // 2)
    n_tile = 1
    for d in _divisors(N):
        if d <= n_cap and d * per_n <= target_block:
            n_tile = d
    blk_b = n_tile * per_n

    x5 = x.reshape(N, g, cpg, hw_o, 128)  # free reshape

    def kernel(x_ref, o_ref):
        o_ref[...] = x_ref[...]           # permutation is in the index_maps

    out5 = pl.pallas_call(
        kernel,
        out_shape=jax.ShapeDtypeStruct((N, cpg, g, hw_o, 128), x.dtype),
        grid_spec=pltpu.PrefetchScalarGridSpec(
            num_scalar_prefetch=0,
            grid=(N // n_tile, g, cpg // cpg_tile, hw_o // hw_tile),
            in_specs=[pl.BlockSpec((n_tile, None, cpg_tile, hw_tile, 128),
                                   lambda n, i, t, h: (n, i, t, h, 0))],
            out_specs=pl.BlockSpec((n_tile, cpg_tile, None, hw_tile, 128),
                                   lambda n, i, t, h: (n, t, i, h, 0)),
        ),
        compiler_params=pltpu.CompilerParams(
            dimension_semantics=("parallel",) * 4,
            vmem_limit_bytes=_vmem_limit(cap, 4 * blk_b)),
        cost_estimate=pl.CostEstimate(
            flops=0, transcendentals=0,
            bytes_accessed=2 * N * C * HW * itemsize),
    )(x5)

    return out5.reshape(N, C, H, W)


# ---------------------------------------------------------------------------
# Public entry point + pure-JAX reference.
# ---------------------------------------------------------------------------

def shuffle_block(x, groups):
    """Channel shuffle: out[:, j*g + i] = x[:, i*(C//g) + j]  (ShuffleBlock)."""
    N, C, H, W = x.shape
    g = int(groups)
    assert C % g == 0, "channels must be divisible by groups"
    if g == 1 or g == C:
        return x                          # identity permutation
    HW = H * W
    if HW % 128 == 0 and HW // 128 >= 8:  # lane- and sublane-dense (hw_o,128)
        return _shuffle_large_hw(x, g)
    return _shuffle_small_hw(x, g)


def shuffle_block_ref(x, groups):
    N, C, H, W = x.shape
    g = groups
    return (x.reshape(N, g, C // g, H, W)
             .transpose(0, 2, 1, 3, 4)
             .reshape(N, C, H, W))


if __name__ == "__main__":
    key = jax.random.PRNGKey(0)

    # Small-HW path (in-kernel (g, C/g) swap) — the module's default-sized test.
    N, C, H, W, groups = 2, 4, 16, 16, 2
    x = jax.random.normal(key, (N, C, H, W), dtype=jnp.float32)
    y = jax.block_until_ready(shuffle_block(x, groups))
    assert y.shape == (N, C, H, W)
    assert jnp.array_equal(y, shuffle_block_ref(x, groups))

    # Large-HW path (pure index-map permutation copy).
    x2 = jax.random.normal(jax.random.PRNGKey(1), (2, 8, 32, 32), jnp.float32)
    y2 = jax.block_until_ready(shuffle_block(x2, 4))
    assert jnp.array_equal(y2, shuffle_block_ref(x2, 4))

    print("KERNEL_OK")
</pallas_src>

<mosaic_0001>
module attributes {stable_mosaic.version = 11 : i64} {
  func.func @kernel(%arg0: i32, %arg1: i32, %arg2: memref<1x2x2x256xf32, #tpu.memory_space<vmem>>, %arg3: memref<1x2x2x256xf32, #tpu.memory_space<vmem>>) attributes {dimension_semantics = [#tpu.dimension_semantics<parallel>, #tpu.dimension_semantics<parallel>], iteration_bounds = array<i64: 2, 1>, scalar_prefetch = 0 : i64, scratch_operands = 0 : i64, tpu.core_type = #tpu.core_type<tc>, window_params = [{transform_indices = @transform_0, window_bounds = array<i64: 1, 2, 2, 256>}, {transform_indices = @transform_1, window_bounds = array<i64: 1, 2, 2, 256>}]} {
    %c0 = arith.constant 0 : index
    %c0_0 = arith.constant 0 : index
    %c0_1 = arith.constant 0 : index
    %c0_2 = arith.constant 0 : index
    %0 = vector.load %arg2[%c0, %c0_0, %c0_1, %c0_2] : memref<1x2x2x256xf32, #tpu.memory_space<vmem>>, vector<1x2x1x256xf32>
    %1 = vector.shape_cast %0 : vector<1x2x1x256xf32> to vector<1x2x256xf32>
    %c0_3 = arith.constant 0 : index
    %c0_4 = arith.constant 0 : index
    %c0_5 = arith.constant 0 : index
    %c0_6 = arith.constant 0 : index
    %2 = vector.load %arg3[%c0_3, %c0_4, %c0_5, %c0_6] : memref<1x2x2x256xf32, #tpu.memory_space<vmem>>, vector<1x1x2x256xf32>
    %3 = vector.shape_cast %2 : vector<1x1x2x256xf32> to vector<1x2x256xf32>
    %4 = vector.shape_cast %1 : vector<1x2x256xf32> to vector<1x1x2x256xf32>
    tpu.vector_store %arg3[%c0_3, %c0_4, %c0_5, %c0_6], %4 {strides = array<i32>} : memref<1x2x2x256xf32, #tpu.memory_space<vmem>>, vector<1x1x2x256xf32>,
    %c0_7 = arith.constant 0 : index
    %c0_8 = arith.constant 0 : index
    %c1 = arith.constant 1 : index
    %c0_9 = arith.constant 0 : index
    %5 = vector.load %arg2[%c0_7, %c0_8, %c1, %c0_9] : memref<1x2x2x256xf32, #tpu.memory_space<vmem>>, vector<1x2x1x256xf32>
    %6 = vector.shape_cast %5 : vector<1x2x1x256xf32> to vector<1x2x256xf32>
    %c0_10 = arith.constant 0 : index
    %c1_11 = arith.constant 1 : index
    %c0_12 = arith.constant 0 : index
    %c0_13 = arith.constant 0 : index
    %7 = vector.load %arg3[%c0_10, %c1_11, %c0_12, %c0_13] : memref<1x2x2x256xf32, #tpu.memory_space<vmem>>, vector<1x1x2x256xf32>
    %8 = vector.shape_cast %7 : vector<1x1x2x256xf32> to vector<1x2x256xf32>
    %9 = vector.shape_cast %6 : vector<1x2x256xf32> to vector<1x1x2x256xf32>
    tpu.vector_store %arg3[%c0_10, %c1_11, %c0_12, %c0_13], %9 {strides = array<i32>} : memref<1x2x2x256xf32, #tpu.memory_space<vmem>>, vector<1x1x2x256xf32>,
    return
  }
  func.func @transform_0(%arg0: i32, %arg1: i32) -> (i32, i32, i32, i32) {
    %c0_i32 = arith.constant 0 : i32
    %c0_i32_0 = arith.constant 0 : i32
    %c0_i32_1 = arith.constant 0 : i32
    return %arg0, %c0_i32, %arg1, %c0_i32_0 : i32, i32, i32, i32
  }
  func.func @transform_1(%arg0: i32, %arg1: i32) -> (i32, i32, i32, i32) {
    %c0_i32 = arith.constant 0 : i32
    %c0_i32_0 = arith.constant 0 : i32
    %c0_i32_1 = arith.constant 0 : i32
    return %arg0, %arg1, %c0_i32, %c0_i32_0 : i32, i32, i32, i32
  }
}

</mosaic_0001>

<bundles_post_ra>
// kernel: tpu_custom_call.1
= control target key start
LH: loop header
LB: loop body
LE: loop exit
PB: predicated region body
PF: predicated region fallthrough
CT: control target
= control target key end

     0   :  { %6 = vsyncpa [#allocation3], 0  ;;  %s621_s0 = inlined_call_operand.hbm [shape: f32[2,2,2,256], index: 0, kind: input, shape index: {}]   ;;  %s622_s1 = inlined_call_operand.hbm [shape: f32[2,2,2,256], index: 1, kind: output, shape index: {}]  }
   0x1   :  { %8 = vsyncpa [#allocation3 + $0x1], 0 }
   0x2   :  { %9 = vsyncpa [#allocation4], 0 }
   0x3   :  { %11 = vsyncpa [#allocation4 + $0x1], 0  ;;  %s501_s6 = smov 0   ;;  %s503_s7 = smov 0  }
   0x4   :  { %s505_s8 = smov 0   ;;  %s507_s9 = smov 0  }
   0x5   :  { %s509_s10 = smov 0   ;;  %s511_s11 = smov 0  }
   0x6 LB: > { %s286_s12 = sadd.s32 4294967295, %s485_s11   ;;  %s287_s13 = sadd.s32 4294967294, %s485_s11   ;;  %s485_s11 = sphi %s511_s11, %s17_s11   ;;  %s481_s10 = sphi %s509_s10, %s631_s10   ;;  %s477_s9 = sphi %s507_s9, %s630_s9   ;;  %s473_s8 = sphi %s505_s8, %s629_s8   ;;  %s469_s7 = sphi %s503_s7, %s628_s7   ;;  %s465_s6 = sphi %s501_s6, %s627_s6  }
   0x7   : > { %s29_s14 = sadd.s32 1, %s481_s10  ;;  %s38_s15 = sadd.s32 1, %s473_s8 }
   0x8   : > { %p31_p0 = scmp.ge.s32.totalorder %s29_s14, 2  ;;  %p45_p1 = scmp.ne.s32.totalorder %s473_s8, %s469_s7 }
   0x9   : > { %p46_p2 = scmp.eq.s32.totalorder %s485_s11, 0  ;;  %p51_p3 = scmp.ne.s32.totalorder %s469_s7, %s465_s6 }
   0xa   : > { %s633_s14 = smov (%p31_p0, %s29_s14), 0  ;;  %p52_p5 = scmp.eq.s32.totalorder %s286_s12, 0 }
   0xb   : > { %p542_p4 = por %p46_p2, %p45_p1  ;;  %s33_s17 = ssub.s32 %s481_s10, %s633_s14 }
   0xc   : > { %p77_p6 = scmp.eq.s32.totalorder %s286_s12, 1  ;;  %p36_p7 = scmp.eq.s32.totalorder %s33_s17, 0 }
   0xd   : > { %p548_p8 = por %p52_p5, %p51_p3  ;;  %p83_p10 = scmp.eq.s32.totalorder %s287_s13, 1 }
   0xe   : > { %p552_p9 = por %p77_p6, %p45_p1  ;;  %p289_p12 = scmp.ge.s32.totalorder %s485_s11, 2 }
   0xf   : > { %s557_s20 = scalar_select %p36_p7, %s473_s8, %s38_s15  }
  0x10   : > { %p559_p11 = por %p83_p10, %p51_p3  ;;  %p319_p13 = scmp.lt.s32.totalorder %s485_s11, 2 }
  0x11   : > { %s103_s22 = sand.u32 1, %s473_s8   ;;  %s305_s24 = sshll.u32 %s481_s10, 3 }
  0x12   : > { %s290_s23 = sshll.u32 %s103_s22, 3  ;;  %s114_s27 = scalar_lea.hbm %s621_s0, %s305_s24 }
  0x13   : > { %s107_s28 = scalar_lea.vmem [#allocation2], %s290_s23  ;;  %s115_s30 = sshll.u32 %s114_s27, 4  ;;  %s116_s30 = int_to_ptr.hbm [resolvable:$true] %s115_s30 }
  0x14   : > { %s117_s29 = sshll.u32 %s107_s28, 4  ;;  %p312_p0 = pnand %p319_p13, %p542_p4  ;;  %s118_s29 = int_to_ptr.vmem [resolvable:$true] %s117_s29 }
  0x15   : > { %p293_p1 = scmp.ge.s32.totalorder %s485_s11, 1  ;;  %s104_s2 = scalar_lea.sflag [#allocation3], %s103_s22 }
  0x16   : > { %s487_s3 = smov 64   ;;  %s488_s4 = smov 4  }
  0x17   : > { %314 = dma.hbm_to_vmem [thread:$0]  (!%p312_p0), %s116_s30, 128, %s118_s29, %s104_s2, %s487_s3, %s487_s3, %s488_s4  }
  0x18   : > { %p125_p2 = scmp.lt.s32.totalorder %s485_s11, 3 }
  0x1a   : > { %p126_p3 = pnand %p293_p1, %p125_p2 }
  0x1b   : > { %s575_s5 = sand.u32 (!%p126_p3), 1, %s469_s7  }
  0x1c   : > { %129 = sbr.rel (%p126_p3) target bundleno = 58 (0x3a), region = 24  ;;  %s294_s12 = sshll.u32 (!%p126_p3), %s575_s5, 3 }
  0x1d   : > { %s132_s13 = scalar_lea.sflag (!%p126_p3), [#allocation3], %s575_s5  ;;  %s135_s15 = scalar_lea.vmem (!%p126_p3), [#allocation2], %s294_s12 }
  0x21   : > { %456 = dma.done.wait (%p548_p8), %s132_s13, 128  }
  0x22   : > { %458 = vsyncadd (%p548_p8), %s132_s13, 4294967168  ;;  %v156_v0 = vld [vmem:[%s135_s15] ss:$2 sm:$0x3]  ;;  %s306_s16 = sshll.u32 %s477_s9, 3  ;;  %s154_s17 = scalar_lea.vmem [#allocation5], %s294_s12 }
  0x23   : > { %v296_v1 = vld [vmem:[%s135_s15 + $0x4] ss:$2 sm:$0x3]  ;;  %161 = vst [vmem:[#allocation1] ss:$2 sm:$0xff] %v156_v0  ;;  %s195_s18 = scalar_lea.hbm %s622_s1, %s306_s16  ;;  %s196_s24 = sshll.u32 %s154_s17, 4  ;;  %s197_s24 = int_to_ptr.vmem [resolvable:$true] %s196_s24 }
  0x24   : > { %163 = vst [vmem:[#allocation1 + $0x1] ss:$2 sm:$0xff] %v296_v1  ;;  %v297_v2 = vld [vmem:[%s135_s15 + $0x1] ss:$2 sm:$0x3]  ;;  %s198_s25 = sshll.u32 %s195_s18, 4  ;;  %s199_s25 = int_to_ptr.hbm [resolvable:$true] %s198_s25 }
  0x25   : > { %v298_v4 = vld [vmem:[%s135_s15 + $0x5] ss:$2 sm:$0x3]  ;;  %s181_s26 = scalar_lea.sflag [#allocation4], %s575_s5  ;;  %s417_s27 = sshra.s32 %s199_s25, 4  ;;  %s418_s27 = int_to_ptr.hbm [resolvable:$true] %s417_s27 }
  0x26   : > { %s419_s28 = scalar_lea.hbm %s418_s27, 8  ;;  %s423_s30 = scalar_lea.hbm %s622_s1, 16 }
  0x27   : > { %p420_p4 = scmp.ne.s32.totalorder %s418_s27, %s419_s28  ;;  %p424_p7 = scmp.lt.s32.totalorder %s418_s27, %s622_s1 }
  0x28   : > { %p425_p8 = scmp.lt.s32.totalorder %s423_s30, %s419_s28 }
  0x29   : > { %p421_p5 = pnand %p420_p4, %p552_p9 }
  0x2a   : > { %p426_p10 = por %p425_p8, %p424_p7 }
  0x2b   : > { %v164_v3 = vld [vmem:[#allocation1] sm:$0xff]  ;;  %p422_p6 = pneg %p421_p5 }
  0x2c   : > { %166 = vst [vmem:[%s154_s17] sm:$0xf] %v164_v3 }
  0x2d   : > { %173 = vst [vmem:[#allocation1] ss:$2 sm:$0xff] %v297_v2  ;;  %p427_p13 = pnand %p426_p10, %p422_p6 }
  0x2e   : > { %175 = vst [vmem:[#allocation1 + $0x1] ss:$2 sm:$0xff] %v298_v4 }
  0x35   : > { %v176_v5 = vld [vmem:[#allocation1] sm:$0xff] }
  0x36   : > { %299 = vst [vmem:[%s154_s17 + $0x4] sm:$0xf] %v176_v5 }
  0x37   : > { %430 = shalt.err (!%p427_p13)
}
  0x38   : > { %s489_s4 = smov 64   ;;  %s490_s5 = smov 4  }
  0x39   : > { %309 = dma.vmem_to_hbm [thread:$0]  (%p552_p9), %s197_s24, 128, %s199_s25, %s181_s26, %s489_s4, %s489_s4, %s490_s5  }
  0x3a PF: > { %s213_s12 = sand.u32 1, %s465_s6   ;;  %p316_p0 = pnand %p289_p12, %p559_p11 }
  0x3b   : > { %s214_s13 = scalar_lea.sflag [#allocation4], %s213_s12 }
  0x3c   : > { %p317_p1 = pneg %p316_p0 }
  0x3e   : > { %460 = dma.done.wait (%p317_p1), %s214_s13, 128  }
  0x3f   : > { %462 = vsyncadd (%p317_p1), %s214_s13, 4294967168  ;;  %s17_s11 = sadd.s32 1, %s485_s11   ;;  %s627_s6 = smov %s469_s7 }
  0x40   : > { %p14_p2 = scmp.ge.s32.totalorder %s17_s11, 4   ;;  %s628_s7 = smov %s473_s8 }
  0x41   : > { %s629_s8 = smov %s557_s20  ;;  %s630_s9 = smov %s481_s10 }
  0x42   : > { %s631_s10 = smov %s633_s14  ;;  %16 = sbr.rel (!%p14_p2) target bundleno = 6 (0x6), region = 75 }
  0x47   :  { %220 = vsyncpa [#allocation3], 1 }
  0x48   :  { %222 = vsyncpa [#allocation3 + $0x1], 1 }
  0x49   :  { %223 = vsyncpa [#allocation4], 1 }
  0x4a   :  { %225 = vsyncpa [#allocation4 + $0x1], 1 }

</bundles_post_ra>
